<compile_context>
chip_gen: v7x
topology: tpu7x:2x2x1
jax: 0.10.0
libtpu: 0.0.40
codegen_flags: <defaults>
</compile_context>

<pallas_src>
import functools

import jax
import jax.numpy as jnp
from jax.experimental import pallas as pl
from jax.experimental.pallas import tpu as pltpu


# --------------------------------------------------------------------------- #
# Kernel
# --------------------------------------------------------------------------- #
def _actor_kernel(x_ref, w1_ref, b1_ref, w2_ref, b2_ref, w3_ref, b3_ref,
                  y_ref, *, action_dim, discrete):
    # Cast activations to the MXU dtype in-kernel (f32 kept in HBM/VMEM).
    x = x_ref[...].astype(w1_ref.dtype)

    # Hidden layer 1: Linear + Tanh (MXU matmul, f32 accumulate, f32 tanh).
    h1 = jnp.tanh(
        jnp.dot(x, w1_ref[...], preferred_element_type=jnp.float32)
        + b1_ref[...]
    )
    # Hidden layer 2: Linear + Tanh.
    h2 = jnp.tanh(
        jnp.dot(h1.astype(w2_ref.dtype), w2_ref[...],
                preferred_element_type=jnp.float32)
        + b2_ref[...]
    )
    # Output layer: one lane-dense (TB, out_pad) slab.
    y = (jnp.dot(h2.astype(w3_ref.dtype), w3_ref[...],
                 preferred_element_type=jnp.float32)
         + b3_ref[...])

    if discrete:
        y_ref[...] = y
    else:
        # Clamp only the real log_std lanes; padded lanes stay untouched.
        lane = jax.lax.broadcasted_iota(jnp.int32, y.shape, dimension=1)
        is_log_std = (lane >= action_dim) & (lane < 2 * action_dim)
        y_ref[...] = jnp.where(is_log_std, jnp.clip(y, -20.0, 2.0), y)


# --------------------------------------------------------------------------- #
# Helpers
# --------------------------------------------------------------------------- #
def _round_up(x, m):
    return ((x + m - 1) // m) * m


def _resident_spec(shape):
    """Constant-index (weight-resident) BlockSpec, single-buffered if supported."""
    const = lambda i: (0,) * len(shape)
    if hasattr(pl, "Buffered"):
        try:
            return pl.BlockSpec(shape, const, pipeline_mode=pl.Buffered(1))
        except TypeError:  # older JAX without pipeline_mode kwarg
            pass
    return pl.BlockSpec(shape, const)


def prepare_actor_params(params, *, mxu_dtype=jnp.bfloat16, lane_pad=128):
    """Zero-pad hidden/out feature dims to `lane_pad` lanes and cast weights
    to the MXU dtype. Call ONCE, outside jit (not per forward call).

    Zero padding is exact: tanh(0)=0, padded rows/cols contribute 0 to dots,
    padded output lanes are 0 and get sliced off in the wrapper.
    """
    # TODO(synk): on v6e/v7x a lane_pad of 256 better fills the 256x256 MXU
    # tile; 128 is the portable default (enough for v5e).
    w1, b1, w2, b2, w3, b3 = params
    hidden = w1.shape[1]
    out = w3.shape[1]
    hp = _round_up(hidden, lane_pad)
    op = _round_up(out, lane_pad)

    w1p = jnp.pad(w1, ((0, 0), (0, hp - hidden))).astype(mxu_dtype)
    b1p = jnp.pad(b1, ((0, 0), (0, hp - hidden))).astype(jnp.float32)
    w2p = jnp.pad(w2, ((0, hp - hidden), (0, hp - hidden))).astype(mxu_dtype)
    b2p = jnp.pad(b2, ((0, 0), (0, hp - hidden))).astype(jnp.float32)
    w3p = jnp.pad(w3, ((0, hp - hidden), (0, op - out))).astype(mxu_dtype)
    b3p = jnp.pad(b3, ((0, 0), (0, op - out))).astype(jnp.float32)
    return (w1p, b1p, w2p, b2p, w3p, b3p)


# --------------------------------------------------------------------------- #
# Wrapper
# --------------------------------------------------------------------------- #
def actor_forward(x, prepared_params, *, action_dim, discrete=False,
                  out_dim=None, max_tb=1024):
    """Pallas Actor forward.

    x: (B, state_dim) f32.
    prepared_params: output of prepare_actor_params (padded, bf16 weights).
    Returns (mean, log_std) if not discrete, else raw logits (B, out_dim).
    """
    w1, b1, w2, b2, w3, b3 = prepared_params
    B, state_dim = x.shape
    hp = w1.shape[1]           # padded hidden dim
    op = w3.shape[1]           # padded output dim
    if out_dim is None:
        if discrete:
            raise ValueError("discrete=True requires out_dim (= sum(n_actions_per_dim))")
        out_dim = 2 * action_dim
    assert out_dim <= op

    # ---- batch tiling: 16-row aligned (bf16 vreg packs [16,128]),
    #      tile derived from the actual B so padding stays minimal,
    #      >=2 grid steps for larger batches (v7x's 2 TCs). ---------------
    b16 = _round_up(B, 16)
    n_steps = max(1, -(-b16 // max_tb))
    if n_steps == 1 and b16 >= 256:
        n_steps = 2
    TB = _round_up(-(-b16 // n_steps), 16)
    B_pad = TB * n_steps
    if B_pad != B:
        x = jnp.pad(x, ((0, B_pad - B), (0, 0)))
    grid = (n_steps,)

    w_itemsize = jnp.dtype(w1.dtype).itemsize

    # ---- advisory cost estimate (padded shapes = actual work) --------------
    flops = 2 * B_pad * (state_dim * hp + hp * hp + hp * op)
    transcendentals = 2 * B_pad * hp
    bytes_accessed = (
        B_pad * state_dim * 4
        + (state_dim * hp + hp * hp + hp * op) * w_itemsize
        + (2 * hp + op) * 4
        + B_pad * op * 4
    )

    # ---- VMEM budget: double-buffered x/out, single-buffered weights -------
    vmem_needed = (
        2 * TB * state_dim * 4                              # x (f32) double buffer
        + 2 * TB * op * 4                                   # out double buffer
        + (state_dim * hp + hp * hp + hp * op) * w_itemsize # resident weights
        + (2 * hp + op) * 4                                 # biases
        + 4 * TB * hp * 4                                   # f32 intermediates
    )
    vmem_limit = int(min(40 << 20, max(4 << 20, 2 * vmem_needed)))

    kernel = functools.partial(_actor_kernel,
                               action_dim=action_dim, discrete=discrete)

    y = pl.pallas_call(
        kernel,
        out_shape=jax.ShapeDtypeStruct((B_pad, op), jnp.float32),
        grid_spec=pltpu.PrefetchScalarGridSpec(
            num_scalar_prefetch=0,
            grid=grid,
            in_specs=[
                pl.BlockSpec((TB, state_dim), lambda i: (i, 0)),   # x
                _resident_spec((state_dim, hp)),                   # w1
                _resident_spec((1, hp)),                           # b1
                _resident_spec((hp, hp)),                          # w2
                _resident_spec((1, hp)),                           # b2
                _resident_spec((hp, op)),                          # w3
                _resident_spec((1, op)),                           # b3
            ],
            out_specs=pl.BlockSpec((TB, op), lambda i: (i, 0)),
        ),
        compiler_params=pltpu.CompilerParams(
            dimension_semantics=("parallel",),
            vmem_limit_bytes=vmem_limit,
        ),
        cost_estimate=pl.CostEstimate(
            flops=flops,
            transcendentals=transcendentals,
            bytes_accessed=bytes_accessed,
        ),
    )(x, w1, b1, w2, b2, w3, b3)

    y = y[:B, :out_dim]
    if discrete:
        return y
    return y[:, :action_dim], y[:, action_dim:]


# --------------------------------------------------------------------------- #
# Params + reference
# --------------------------------------------------------------------------- #
def init_actor_params(key, state_dim, hidden_dim, action_dim):
    """Deterministic synthetic params. Weights stored (in, out); biases (1, out)."""
    ks = jax.random.split(key, 6)
    s1 = 1.0 / jnp.sqrt(state_dim)
    s2 = 1.0 / jnp.sqrt(hidden_dim)
    w1 = jax.random.uniform(ks[0], (state_dim, hidden_dim), jnp.float32, -s1, s1)
    b1 = jax.random.uniform(ks[1], (1, hidden_dim), jnp.float32, -s1, s1)
    w2 = jax.random.uniform(ks[2], (hidden_dim, hidden_dim), jnp.float32, -s2, s2)
    b2 = jax.random.uniform(ks[3], (1, hidden_dim), jnp.float32, -s2, s2)
    w3 = jax.random.uniform(ks[4], (hidden_dim, action_dim * 2), jnp.float32, -s2, s2)
    b3 = jax.random.uniform(ks[5], (1, action_dim * 2), jnp.float32, -s2, s2)
    return (w1, b1, w2, b2, w3, b3)


def _actor_ref(x, params, mxu_dtype=jnp.bfloat16):
    """Pure-JAX reference mirroring the kernel's bf16-operand / f32-accum math."""
    w1, b1, w2, b2, w3, b3 = params
    dot = lambda a, b: jnp.dot(a.astype(mxu_dtype), b.astype(mxu_dtype),
                               preferred_element_type=jnp.float32)
    h1 = jnp.tanh(dot(x, w1) + b1)
    h2 = jnp.tanh(dot(h1, w2) + b2)
    y = dot(h2, w3) + b3
    a = y.shape[-1] // 2
    return y[:, :a], jnp.clip(y[:, a:], -20.0, 2.0)


# --------------------------------------------------------------------------- #
# Main
# --------------------------------------------------------------------------- #
if __name__ == "__main__":
    # Small shapes consistent with the module's forward (discrete=False path).
    batch = 8
    state_dim = 32
    hidden_dim = 32
    action_dim = 4

    key = jax.random.PRNGKey(0)
    k_x, k_p = jax.random.split(key)
    x = jax.random.normal(k_x, (batch, state_dim), dtype=jnp.float32)
    params = init_actor_params(k_p, state_dim, hidden_dim, action_dim)

    # One-time (outside jit): lane-pad to 128 and cast weights to bf16.
    prepared = jax.block_until_ready(prepare_actor_params(params))

    fwd = jax.jit(functools.partial(actor_forward,
                                    action_dim=action_dim, discrete=False))
    mean, log_std = fwd(x, prepared)
    jax.block_until_ready((mean, log_std))

    # Correctness check against a pure-JAX reference with matching precision.
    mean_ref, log_std_ref = _actor_ref(x, params)
    assert mean.shape == (batch, action_dim)
    assert log_std.shape == (batch, action_dim)
    assert jnp.allclose(mean, mean_ref, atol=1e-3, rtol=1e-3)
    assert jnp.allclose(log_std, log_std_ref, atol=1e-3, rtol=1e-3)
    assert jnp.all(log_std <= 2.0) and jnp.all(log_std >= -20.0)

    print("KERNEL_OK")
</pallas_src>

<mosaic_0001>
module attributes {stable_mosaic.version = 11 : i64} {
  func.func @_actor_kernel(%arg0: i32, %arg1: memref<16x32xf32, #tpu.memory_space<vmem>>, %arg2: memref<32x128xbf16, #tpu.memory_space<vmem>>, %arg3: memref<1x128xf32, #tpu.memory_space<vmem>>, %arg4: memref<128x128xbf16, #tpu.memory_space<vmem>>, %arg5: memref<1x128xf32, #tpu.memory_space<vmem>>, %arg6: memref<128x128xbf16, #tpu.memory_space<vmem>>, %arg7: memref<1x128xf32, #tpu.memory_space<vmem>>, %arg8: memref<16x128xf32, #tpu.memory_space<vmem>>) attributes {dimension_semantics = [#tpu.dimension_semantics<parallel>], iteration_bounds = array<i64: 1>, scalar_prefetch = 0 : i64, scratch_operands = 0 : i64, tpu.core_type = #tpu.core_type<tc>, window_params = [{transform_indices = @transform_0, window_bounds = array<i64: 16, 32>}, {pipeline_mode = #tpu.pipeline_mode<synchronous>, transform_indices = @transform_1, window_bounds = array<i64: 32, 128>}, {pipeline_mode = #tpu.pipeline_mode<synchronous>, transform_indices = @transform_2, window_bounds = array<i64: 1, 128>}, {pipeline_mode = #tpu.pipeline_mode<synchronous>, transform_indices = @transform_3, window_bounds = array<i64: 128, 128>}, {pipeline_mode = #tpu.pipeline_mode<synchronous>, transform_indices = @transform_4, window_bounds = array<i64: 1, 128>}, {pipeline_mode = #tpu.pipeline_mode<synchronous>, transform_indices = @transform_5, window_bounds = array<i64: 128, 128>}, {pipeline_mode = #tpu.pipeline_mode<synchronous>, transform_indices = @transform_6, window_bounds = array<i64: 1, 128>}, {transform_indices = @transform_7, window_bounds = array<i64: 16, 128>}]} {
    %c0 = arith.constant 0 : index
    %c0_0 = arith.constant 0 : index
    %0 = vector.load %arg1[%c0, %c0_0] : memref<16x32xf32, #tpu.memory_space<vmem>>, vector<16x32xf32>
    %1 = arith.truncf %0 : vector<16x32xf32> to vector<16x32xbf16>
    %c0_1 = arith.constant 0 : index
    %c0_2 = arith.constant 0 : index
    %2 = vector.load %arg2[%c0_1, %c0_2] : memref<32x128xbf16, #tpu.memory_space<vmem>>, vector<32x128xbf16>
    %cst = arith.constant dense<0.000000e+00> : vector<16x128xf32>
    %3 = tpu.matmul %1, %2, %cst {dimension_numbers = #tpu.dot_dimension_numbers<[1], [0], [0], [1], [0, 0, 1, 1], [], []>} : vector<16x32xbf16>, vector<32x128xbf16>, vector<16x128xf32> -> vector<16x128xf32>
    %c0_3 = arith.constant 0 : index
    %c0_4 = arith.constant 0 : index
    %4 = vector.load %arg3[%c0_3, %c0_4] : memref<1x128xf32, #tpu.memory_space<vmem>>, vector<1x128xf32>
    %5 = vector.broadcast %4 : vector<1x128xf32> to vector<16x128xf32>
    %6 = arith.addf %3, %5 : vector<16x128xf32>
    %7 = math.tanh %6 : vector<16x128xf32>
    %8 = arith.truncf %7 : vector<16x128xf32> to vector<16x128xbf16>
    %c0_5 = arith.constant 0 : index
    %c0_6 = arith.constant 0 : index
    %9 = vector.load %arg4[%c0_5, %c0_6] : memref<128x128xbf16, #tpu.memory_space<vmem>>, vector<128x128xbf16>
    %cst_7 = arith.constant dense<0.000000e+00> : vector<16x128xf32>
    %10 = tpu.matmul %8, %9, %cst_7 {dimension_numbers = #tpu.dot_dimension_numbers<[1], [0], [0], [1], [0, 0, 1, 1], [], []>} : vector<16x128xbf16>, vector<128x128xbf16>, vector<16x128xf32> -> vector<16x128xf32>
    %c0_8 = arith.constant 0 : index
    %c0_9 = arith.constant 0 : index
    %11 = vector.load %arg5[%c0_8, %c0_9] : memref<1x128xf32, #tpu.memory_space<vmem>>, vector<1x128xf32>
    %12 = vector.broadcast %11 : vector<1x128xf32> to vector<16x128xf32>
    %13 = arith.addf %10, %12 : vector<16x128xf32>
    %14 = math.tanh %13 : vector<16x128xf32>
    %15 = arith.truncf %14 : vector<16x128xf32> to vector<16x128xbf16>
    %c0_10 = arith.constant 0 : index
    %c0_11 = arith.constant 0 : index
    %16 = vector.load %arg6[%c0_10, %c0_11] : memref<128x128xbf16, #tpu.memory_space<vmem>>, vector<128x128xbf16>
    %cst_12 = arith.constant dense<0.000000e+00> : vector<16x128xf32>
    %17 = tpu.matmul %15, %16, %cst_12 {dimension_numbers = #tpu.dot_dimension_numbers<[1], [0], [0], [1], [0, 0, 1, 1], [], []>} : vector<16x128xbf16>, vector<128x128xbf16>, vector<16x128xf32> -> vector<16x128xf32>
    %c0_13 = arith.constant 0 : index
    %c0_14 = arith.constant 0 : index
    %18 = vector.load %arg7[%c0_13, %c0_14] : memref<1x128xf32, #tpu.memory_space<vmem>>, vector<1x128xf32>
    %19 = vector.broadcast %18 : vector<1x128xf32> to vector<16x128xf32>
    %20 = arith.addf %17, %19 : vector<16x128xf32>
    %21 = tpu.iota {dimensions = array<i32: 1>} : vector<16x128xi32>
    %c4_i32 = arith.constant 4 : i32
    %22 = vector.broadcast %c4_i32 : i32 to vector<16x128xi32>
    %23 = arith.cmpi sge, %21, %22 : vector<16x128xi32>
    %c8_i32 = arith.constant 8 : i32
    %24 = vector.broadcast %c8_i32 : i32 to vector<16x128xi32>
    %25 = arith.cmpi slt, %21, %24 : vector<16x128xi32>
    %26 = arith.andi %23, %25 : vector<16x128xi1>
    %cst_15 = arith.constant -2.000000e+01 : f32
    %cst_16 = arith.constant 2.000000e+00 : f32
    %27 = vector.broadcast %cst_15 : f32 to vector<16x128xf32>
    %28 = arith.maximumf %27, %20 : vector<16x128xf32>
    %29 = vector.broadcast %cst_16 : f32 to vector<16x128xf32>
    %30 = arith.minimumf %29, %28 : vector<16x128xf32>
    %31 = arith.select %26, %30, %20 : vector<16x128xi1>, vector<16x128xf32>
    %c0_17 = arith.constant 0 : index
    %c0_18 = arith.constant 0 : index
    %32 = vector.load %arg8[%c0_17, %c0_18] : memref<16x128xf32, #tpu.memory_space<vmem>>, vector<16x128xf32>
    tpu.vector_store %arg8[%c0_17, %c0_18], %31 {strides = array<i32>} : memref<16x128xf32, #tpu.memory_space<vmem>>, vector<16x128xf32>,
    return
  }
  func.func @transform_0(%arg0: i32) -> (i32, i32) {
    %c0_i32 = arith.constant 0 : i32
    %c0_i32_0 = arith.constant 0 : i32
    return %arg0, %c0_i32 : i32, i32
  }
  func.func @transform_1(%arg0: i32) -> (i32, i32) {
    %c0_i32 = arith.constant 0 : i32
    %c0_i32_0 = arith.constant 0 : i32
    %c0_i32_1 = arith.constant 0 : i32
    return %c0_i32, %c0_i32_0 : i32, i32
  }
  func.func @transform_2(%arg0: i32) -> (i32, i32) {
    %c0_i32 = arith.constant 0 : i32
    %c0_i32_0 = arith.constant 0 : i32
    %c0_i32_1 = arith.constant 0 : i32
    return %c0_i32, %c0_i32_0 : i32, i32
  }
  func.func @transform_3(%arg0: i32) -> (i32, i32) {
    %c0_i32 = arith.constant 0 : i32
    %c0_i32_0 = arith.constant 0 : i32
    %c0_i32_1 = arith.constant 0 : i32
    return %c0_i32, %c0_i32_0 : i32, i32
  }
  func.func @transform_4(%arg0: i32) -> (i32, i32) {
    %c0_i32 = arith.constant 0 : i32
    %c0_i32_0 = arith.constant 0 : i32
    %c0_i32_1 = arith.constant 0 : i32
    return %c0_i32, %c0_i32_0 : i32, i32
  }
  func.func @transform_5(%arg0: i32) -> (i32, i32) {
    %c0_i32 = arith.constant 0 : i32
    %c0_i32_0 = arith.constant 0 : i32
    %c0_i32_1 = arith.constant 0 : i32
    return %c0_i32, %c0_i32_0 : i32, i32
  }
  func.func @transform_6(%arg0: i32) -> (i32, i32) {
    %c0_i32 = arith.constant 0 : i32
    %c0_i32_0 = arith.constant 0 : i32
    %c0_i32_1 = arith.constant 0 : i32
    return %c0_i32, %c0_i32_0 : i32, i32
  }
  func.func @transform_7(%arg0: i32) -> (i32, i32) {
    %c0_i32 = arith.constant 0 : i32
    %c0_i32_0 = arith.constant 0 : i32
    return %arg0, %c0_i32 : i32, i32
  }
}

</mosaic_0001>

<bundles_post_ra>
// kernel: actor_forward.1
= control target key start
LH: loop header
LB: loop body
LE: loop exit
PB: predicated region body
PF: predicated region fallthrough
CT: control target
= control target key end

     0   :  { %12 = vsyncpa [#allocation3], 0  ;;  %s667_s0 = inlined_call_operand.vmem [shape: f32[16,32], index: 0, kind: input, shape index: {}]   ;;  %s668_s1 = inlined_call_operand.vmem [shape: bf16[32,128], index: 1, kind: input, shape index: {}]   ;;  %s669_s2 = inlined_call_operand.vmem [shape: f32[1,128], index: 2, kind: input, shape index: {}]   ;;  %s670_s3 = inlined_call_operand.hbm [shape: bf16[128,128], index: 3, kind: input, shape index: {}]   ;;  %s671_s4 = inlined_call_operand.vmem [shape: f32[1,128], index: 4, kind: input, shape index: {}]   ;;  %s672_s5 = inlined_call_operand.hbm [shape: bf16[128,128], index: 5, kind: input, shape index: {}]   ;;  %s673_s6 = inlined_call_operand.vmem [shape: f32[1,128], index: 6, kind: input, shape index: {}]   ;;  %s674_s7 = inlined_call_operand.vmem [shape: f32[16,128], index: 7, kind: output, shape index: {}]  }
   0x1   :  { %13 = vsyncpa [#allocation5], 0  ;;  %s546_s24 = smov [#allocation2]   ;;  %s498_s28 = scalar_lea.hbm %s670_s3, 1024 }
   0x2   :  { %s25_s25 = sshll.u32 %s546_s24, 4  ;;  %p499_p0 = scmp.ne.s32.totalorder %s670_s3, %s498_s28  ;;  %s26_s25 = int_to_ptr.vmem [resolvable:$true] %s25_s25 }
   0x3   :  { %p502_p1 = scmp.lt.u32.totalorder %s498_s28, %s670_s3 }
   0x5   :  { %p504_p2 = pnand %p502_p1, %p499_p0 }
   0x7   :  { %507 = shalt.err (!%p504_p2)
}
   0x8   :  { %s508_s10 = scalar_lea.vmem %s26_s25, 1024  ;;  %p513_p4 = scmp.lt.s32.totalorder %s26_s25, %s26_s25 }
   0x9   :  { %p509_p3 = scmp.ne.s32.totalorder %s26_s25, %s508_s10  ;;  %p514_p5 = scmp.lt.s32.totalorder %s508_s10, %s508_s10 }
   0xb   :  { %p515_p6 = por %p514_p5, %p513_p4 }
   0xd   :  { %p516_p7 = pnand %p515_p6, %p509_p3 }
   0xf   :  { %519 = shalt.err (!%p516_p7)
}
  0x10   :  { %s547_s11 = smov 64   ;;  %s548_s12 = smov 4  }
  0x11   :  { %31 = dma.hbm_to_vmem [thread:$0]  %s670_s3, 1024, %s26_s25, [#allocation3], %s547_s11, %s547_s11, %s548_s12  }
  0x12   :  { %s549_s15 = smov [#allocation4]   ;;  %s520_s19 = scalar_lea.hbm %s672_s5, 1024 }
  0x13   :  { %s39_s16 = sshll.u32 %s549_s15, 4  ;;  %p521_p8 = scmp.ne.s32.totalorder %s672_s5, %s520_s19  ;;  %s40_s16 = int_to_ptr.vmem [resolvable:$true] %s39_s16 }
  0x14   :  { %p524_p9 = scmp.lt.u32.totalorder %s520_s19, %s672_s5 }
  0x16   :  { %p526_p10 = pnand %p524_p9, %p521_p8 }
  0x18   :  { %529 = shalt.err (!%p526_p10)
}
  0x19   :  { %s530_s24 = scalar_lea.vmem %s40_s16, 1024  ;;  %p535_p12 = scmp.lt.s32.totalorder %s40_s16, %s40_s16 }
  0x1a   :  { %p531_p11 = scmp.ne.s32.totalorder %s40_s16, %s530_s24  ;;  %p536_p13 = scmp.lt.s32.totalorder %s530_s24, %s530_s24 }
  0x1c   :  { %p537_p0 = por %p536_p13, %p535_p12 }
  0x1e   :  { %p538_p1 = pnand %p537_p0, %p531_p11 }
  0x20   :  { %541 = shalt.err (!%p538_p1)
}
  0x21   :  { %45 = dma.hbm_to_vmem [thread:$0]  %s672_s5, 1024, %s40_s16, [#allocation5], %s547_s11, %s547_s11, %s548_s12  }
  0x22   :  { %542 = dma.done.wait [#allocation3], 1024  }
  0x23   :  { %543 = vsyncadd [#allocation3], 4294966272 }
  0x24   :  { %544 = dma.done.wait [#allocation5], 1024  }
  0x25   :  { %545 = vsyncadd [#allocation5], 4294966272  ;;  %v550_v0 = vmov 0.0   ;;  %vm551_vm0 = vmmov 0   ;;  %v472_v1 = vld [vmem:[%s668_s1] sm:$0xff]   ;;  %v473_v2 = vld [vmem:[%s668_s1 + $0x8] sm:$0xff]   ;;  %v356_v42 = vlaneseq }
  0x26   :  { %418 = vmatprep.subr.bf16.mxu0 %v550_v0  ;;  %422 = vmatprep.mubr.msk.bf16.mxu0 %vm551_vm0, %v550_v0  ;;  %v55_v3 = vld [vmem:[%s667_s0] sm:$0xff]  ;;  %v56_v4 = vld [vmem:[%s667_s0 + $0x8] sm:$0xff]  ;;  %vm81_vm1 = vcmask 261120   ;;  %v476_v8 = vld [vmem:[#allocation2 + $0x10] sm:$0xff]  }
  0x27   :  { %426 = vmatprep.subr.bf16.mxu1 %v550_v0  ;;  %442 = vmatprep.mubr.msk.bf16.mxu1 %vm551_vm0, %v550_v0  ;;  %v474_v5 = vld [vmem:[#allocation2] sm:$0xff]   ;;  %v57_v6 = vpack.c.bf16 %v56_v4, %v55_v3  ;;  %v475_v7 = vld [vmem:[#allocation2 + $0x8] sm:$0xff]   ;;  %v477_v9 = vld [vmem:[#allocation2 + $0x18] sm:$0xff]   ;;  %v357_v43 = vand.u32 127, %v356_v42 }
  0x28   :  { %419 = vmatpush3.bf16.msra.mxu0 %v472_v1  ;;  %427 = vmatpush3.bf16.msra.mxu1 %v474_v5  ;;  %v478_v10 = vld [vmem:[#allocation2 + $0x20] sm:$0xff]   ;;  %v479_v11 = vld [vmem:[#allocation2 + $0x28] sm:$0xff]   ;;  %v480_v12 = vld [vmem:[#allocation2 + $0x30] sm:$0xff]  }
  0x29   :  { %420 = vmatprep.subr.bf16.mxu0 %v550_v0  ;;  %428 = vmatprep.subr.bf16.mxu1 %v550_v0  ;;  %v481_v13 = vld [vmem:[#allocation2 + $0x38] sm:$0xff]   ;;  %v482_v14 = vld [vmem:[#allocation4] sm:$0xff]   ;;  %v483_v15 = vld [vmem:[#allocation4 + $0x8] sm:$0xff]   ;;  %vm358_vm2 = vcmp.ge.s32.totalorder %v357_v43, 4  ;;  %vm359_vm3 = vcmp.lt.s32.totalorder %v357_v43, 8 }
  0x2a   :  { %v484_v16 = vld [vmem:[#allocation4 + $0x10] sm:$0xff]   ;;  %v485_v17 = vld [vmem:[#allocation4 + $0x18] sm:$0xff]   ;;  %v375_v18 = vld [vmem:[%s669_s2] ss:$0 sm:$0xff] }
  0x2b   :  { %v486_v28 = vld [vmem:[#allocation4 + $0x20] sm:$0xff]   ;;  %v487_v29 = vld [vmem:[#allocation4 + $0x28] sm:$0xff]   ;;  %v488_v30 = vld [vmem:[#allocation4 + $0x30] sm:$0xff]  }
  0x2c   :  { %421 = vmatpush3.bf16.msra.mxu0 %v473_v2  ;;  %429 = vmatpush3.bf16.msra.mxu1 %v475_v7  ;;  %v489_v31 = vld [vmem:[#allocation4 + $0x38] sm:$0xff]   ;;  %v379_v32 = vld [vmem:[%s671_s4] ss:$0 sm:$0xff]  ;;  %vm360_vm4 = vmand %vm358_vm2, %vm359_vm3 }
  0x2d   :  { %446 = vmatprep.subr.bf16.mxu0 %v550_v0  ;;  %430 = vmatprep.subr.bf16.mxu1 %v550_v0  ;;  %v388_v44 = vld [vmem:[%s673_s6] ss:$0 sm:$0xff] }
  0x2f   :  { %423 = vmatmul.mubr.msk.bf16.vlgmr.msra.gmra.mrb[0].mxu0 %vm81_vm1, %v57_v6 }
  0x30   :  { %462 = vmatprep.mubr.msk.bf16.mxu0 %vm551_vm0, %v550_v0  ;;  %431 = vmatpush3.bf16.msra.mxu1 %v476_v8 }
  0x31   :  { %432 = vmatprep.subr.bf16.mxu1 %v550_v0  ;;  %447 = vmatpush3.bf16.msra.mxu0 %v482_v14 }
  0x32   :  { %448 = vmatprep.subr.bf16.mxu0 %v550_v0 }
  0x34   :  { %433 = vmatpush3.bf16.msra.mxu1 %v477_v9 }
  0x35   :  { %434 = vmatprep.subr.bf16.mxu1 %v550_v0  ;;  %449 = vmatpush3.bf16.msra.mxu0 %v483_v15 }
  0x36   :  { %450 = vmatprep.subr.bf16.mxu0 %v550_v0 }
  0x38   :  { %435 = vmatpush3.bf16.msra.mxu1 %v478_v10 }
  0x39   :  { %436 = vmatprep.subr.bf16.mxu1 %v550_v0  ;;  %451 = vmatpush3.bf16.msra.mxu0 %v484_v16 }
  0x3a   :  { %452 = vmatprep.subr.bf16.mxu0 %v550_v0 }
  0x3c   :  { %437 = vmatpush3.bf16.msra.mxu1 %v479_v11 }
  0x3d   :  { %438 = vmatprep.subr.bf16.mxu1 %v550_v0  ;;  %453 = vmatpush3.bf16.msra.mxu0 %v485_v17 }
  0x3e   :  { %454 = vmatprep.subr.bf16.mxu0 %v550_v0 }
  0x40   :  { %439 = vmatpush3.bf16.msra.mxu1 %v480_v12 }
  0x41   :  { %440 = vmatprep.subr.bf16.mxu1 %v550_v0  ;;  %455 = vmatpush3.bf16.msra.mxu0 %v486_v28 }
  0x42   :  { %456 = vmatprep.subr.bf16.mxu0 %v550_v0 }
  0x44   :  { %441 = vmatpush3.bf16.msra.mxu1 %v481_v13 }
  0x45   :  { %457 = vmatpush3.bf16.msra.mxu0 %v487_v29 }
  0x46   :  { %458 = vmatprep.subr.bf16.mxu0 %v550_v0 }
  0x49   :  { %459 = vmatpush3.bf16.msra.mxu0 %v488_v30 }
  0x4a   :  { %460 = vmatprep.subr.bf16.mxu0 %v550_v0 }
  0x4d   :  { %461 = vmatpush3.bf16.msra.mxu0 %v489_v31 }
 0x102   :  { %v119_v19 = vpop.f32.mrb[0].mxu0 }
 0x103   :  { %v120_v20 = vadd.f32 %v375_v18, %v119_v19  ;;  %v424_v21 = vpop.f32.mrb[1].mxu0 }
 0x104   :  { %v122_v22 = vpop.f32.mrb[2].mxu0 }
 0x105   :  { %v123_v23 = vadd.f32 %v375_v18, %v122_v22  ;;  %v425_v24 = vpop.f32.mrb[3].mxu0  ;;  %490 = vtanh.f32 %v120_v20 }
 0x107   :  { %492 = vtanh.f32 %v123_v23 }
 0x10f   :  { %v491_v25 = vpop.eup %490 }
 0x111   :  { %v493_v26 = vpop.eup %492 }
 0x112   :  { %v128_v27 = vpack.c.bf16 %v493_v26, %v491_v25 }
 0x114   :  { %443 = vmatmul.mubr.bf16.vlgmr.msra.gmra.mrb[0].mxu1 %v128_v27 }
 0x1e7   :  { %v234_v33 = vpop.f32.mrb[0].mxu1 }
 0x1e8   :  { %v235_v34 = vadd.f32 %v379_v32, %v234_v33  ;;  %v444_v35 = vpop.f32.mrb[1].mxu1 }
 0x1e9   :  { %v237_v36 = vpop.f32.mrb[2].mxu1 }
 0x1ea   :  { %v238_v37 = vadd.f32 %v379_v32, %v237_v36  ;;  %v445_v38 = vpop.f32.mrb[3].mxu1  ;;  %494 = vtanh.f32 %v235_v34 }
 0x1ec   :  { %496 = vtanh.f32 %v238_v37 }
 0x1f4   :  { %v495_v39 = vpop.eup %494 }
 0x1f6   :  { %v497_v40 = vpop.eup %496 }
 0x1f7   :  { %v243_v41 = vpack.c.bf16 %v497_v40, %v495_v39 }
 0x1f9   :  { %463 = vmatmul.mubr.bf16.vlgmr.msra.gmra.mrb[4].mxu0 %v243_v41 }
 0x2cc   :  { %v349_v45 = vpop.f32.mrb[4].mxu0 }
 0x2cd   :  { %v350_v46 = vadd.f32 %v388_v44, %v349_v45  ;;  %v464_v47 = vpop.f32.mrb[5].mxu0 }
 0x2ce   :  { %v352_v48 = vpop.f32.mrb[6].mxu0 }
 0x2cf   :  { %v361_v49 = vmax.f32 %v350_v46, -20.0  ;;  %v353_v50 = vadd.f32 %v388_v44, %v352_v48  ;;  %v465_v51 = vpop.f32.mrb[7].mxu0 }
 0x2d1   :  { %v363_v52 = vmin.f32 %v361_v49, 2.0  ;;  %v362_v53 = vmax.f32 %v353_v50, -20.0 }
 0x2d3   :  { %v365_v54 = vsel %vm360_vm4, %v363_v52, %v350_v46  ;;  %v364_v55 = vmin.f32 %v362_v53, 2.0 }
 0x2d4   :  { %367 = vst [vmem:[%s674_s7] sm:$0xff] %v365_v54 }
 0x2d5   :  { %v366_v56 = vsel %vm360_vm4, %v364_v55, %v353_v50 }
 0x2d6   :  { %368 = vst [vmem:[%s674_s7 + $0x8] sm:$0xff] %v366_v56 }
 0x2d7   :  { %373 = vsyncpa [#allocation3], 1 }
 0x2d8   :  { %374 = vsyncpa [#allocation5], 1 }

</bundles_post_ra>
